<compile_context>
chip_gen: v6e
topology: v6e:2x2x1
jax: 0.10.0
libtpu: 0.0.40
codegen_flags: <defaults>
</compile_context>

<pallas_src>
import functools

import jax
import jax.numpy as jnp
from jax.experimental import pallas as pl
from jax.experimental.pallas import tpu as pltpu

LOG_STD_MIN = -5.0
LOG_STD_MAX = 2.0
LANE = 128  # single lane tile carrying both heads


def _round_up(x, m):
    return ((x + m - 1) // m) * m


# ----------------------------------------------------------------------------
# Kernel
# ----------------------------------------------------------------------------
def _reparam_box_kernel(state_ref, w_ref, b_ref, out_ref, *, action_dim):
    s = state_ref[...]                                         # (TILE_B, in_dim) f32

    # One fused matmul over a single 128-lane output tile:
    #   lanes [0, A)    -> mean head
    #   lanes [A, 2A)   -> log_std head
    #   lanes [2A, 128) -> zero padding (discarded)
    z = jnp.dot(s, w_ref[...], preferred_element_type=jnp.float32)
    z = z + b_ref[...]                                         # (1, 128) broadcast

    # log_std post-processing applied to the whole 128-lane tile (vreg
    # granularity); mean lanes are restored by the select below and the
    # clip keeps every lane finite through exp.
    ls = jnp.tanh(jnp.clip(z, -10.0, 10.0))
    ls = LOG_STD_MIN + 0.5 * (LOG_STD_MAX - LOG_STD_MIN) * (ls + 1.0)
    std = jnp.exp(ls)

    col = jax.lax.broadcasted_iota(jnp.int32, z.shape, 1)
    out_ref[...] = jnp.where(col < action_dim, z, std).astype(out_ref.dtype)


# ----------------------------------------------------------------------------
# One-time parameter packing (hoisted out of the per-call path)
# ----------------------------------------------------------------------------
def pack_box_params(w_mean, b_mean, w_log_std, b_log_std):
    """Pack both heads into one lane-dense (in_dim, 128) slab. Call ONCE at init.

    w_mean, w_log_std: (in_dim, A) f32  (pre-transposed nn.Linear weights)
    b_mean, b_log_std: (A,) or (1, A) f32
    Returns (w_fused, b_fused, action_dim).
    """
    in_dim, A = w_mean.shape
    assert 2 * A <= LANE, "2 * action_dim must fit in one 128-lane tile"

    w_fused = jnp.zeros((in_dim, LANE), jnp.float32)
    w_fused = w_fused.at[:, :A].set(w_mean.astype(jnp.float32))
    w_fused = w_fused.at[:, A:2 * A].set(w_log_std.astype(jnp.float32))

    b_fused = jnp.zeros((1, LANE), jnp.float32)
    b_fused = b_fused.at[:, :A].set(b_mean.reshape(1, A).astype(jnp.float32))
    b_fused = b_fused.at[:, A:2 * A].set(
        b_log_std.reshape(1, A).astype(jnp.float32))
    return w_fused, b_fused, A


# ----------------------------------------------------------------------------
# Forward wrapper
# ----------------------------------------------------------------------------
def _choose_tile(B, tile_b):
    """Pick a batch tile that minimizes padding and keeps >= 2 grid steps when
    there is enough work to split across the two v7x TensorCores."""
    b8 = _round_up(B, 8)
    steps = max(-(-B // tile_b), 2 if b8 >= 16 else 1)
    eff_tile = _round_up(-(-B // steps), 8)
    b_pad = _round_up(B, eff_tile)
    return eff_tile, b_pad


@functools.partial(jax.jit, static_argnames=("action_dim", "tile_b"))
def reparam_act_box_forward(state, w_fused, b_fused, *, action_dim, tile_b=2048):
    """Pallas forward: returns (mean, std) of the TanhNormal distribution.

    state:   (B, in_dim) f32
    w_fused: (in_dim, 128) f32  -- from pack_box_params (built once at init)
    b_fused: (1, 128) f32
    """
    B, in_dim = state.shape
    A = action_dim

    eff_tile, b_pad = _choose_tile(B, int(tile_b))
    if b_pad != B:
        state = jnp.pad(state, ((0, b_pad - B), (0, 0)))
    grid = (b_pad // eff_tile,)

    kernel = functools.partial(_reparam_box_kernel, action_dim=A)

    out = pl.pallas_call(
        kernel,
        out_shape=jax.ShapeDtypeStruct((b_pad, LANE), jnp.float32),
        grid_spec=pltpu.PrefetchScalarGridSpec(
            num_scalar_prefetch=0,
            grid=grid,
            in_specs=[
                pl.BlockSpec((eff_tile, in_dim), lambda i: (i, 0)),   # state tile
                pl.BlockSpec((in_dim, LANE), lambda i: (0, 0)),       # fused W (VMEM-resident)
                pl.BlockSpec((1, LANE), lambda i: (0, 0)),            # fused b (VMEM-resident)
            ],
            out_specs=pl.BlockSpec((eff_tile, LANE), lambda i: (i, 0)),
        ),
        compiler_params=pltpu.CompilerParams(
            dimension_semantics=("parallel",),
        ),
    )(state, w_fused, b_fused)

    mean = out[:B, :A]
    std = out[:B, A:2 * A]
    return mean, std


# ----------------------------------------------------------------------------
# Reference / init helpers
# ----------------------------------------------------------------------------
def _orthogonal_init(key, in_dim, out_dim, gain):
    """Deterministic orthogonal init (columns orthonormal), as (in_dim, out_dim)."""
    a = jax.random.normal(key, (in_dim, out_dim), dtype=jnp.float32)
    q, r = jnp.linalg.qr(a)
    q = q * jnp.sign(jnp.diagonal(r))[None, :]
    return gain * q


def _reference(state, w_mean, b_mean, w_log_std, b_log_std):
    mean = state @ w_mean + b_mean
    ls = state @ w_log_std + b_log_std
    ls = jnp.tanh(jnp.clip(ls, -10.0, 10.0))
    ls = LOG_STD_MIN + 0.5 * (LOG_STD_MAX - LOG_STD_MIN) * (ls + 1.0)
    return mean, jnp.exp(ls)


if __name__ == "__main__":
    key = jax.random.PRNGKey(0)
    k_state, k_wm, k_ws, k_state2 = jax.random.split(key, 4)

    B, in_dim, action_dim = 8, 32, 4   # shapes consistent with the module

    # Parameter init mirroring init_layer (orthogonal weights, zero bias),
    # then packed ONCE (hoisted out of the per-call forward path).
    w_mean = _orthogonal_init(k_wm, in_dim, action_dim, gain=0.01)      # (in_dim, A)
    b_mean = jnp.zeros((1, action_dim), dtype=jnp.float32)
    w_log_std = _orthogonal_init(k_ws, in_dim, action_dim, gain=1.0)    # (in_dim, A)
    b_log_std = jnp.zeros((1, action_dim), dtype=jnp.float32)
    w_fused, b_fused, A = pack_box_params(w_mean, b_mean, w_log_std, b_log_std)

    # Native small batch.
    state = jax.random.normal(k_state, (B, in_dim), dtype=jnp.float32)
    mean, std = reparam_act_box_forward(state, w_fused, b_fused, action_dim=A)
    jax.block_until_ready((mean, std))

    ref_mean, ref_std = _reference(state, w_mean, b_mean, w_log_std, b_log_std)
    assert mean.shape == (B, action_dim) and std.shape == (B, action_dim)
    assert jnp.allclose(mean, ref_mean, atol=1e-5, rtol=1e-5)
    assert jnp.allclose(std, ref_std, atol=1e-5, rtol=1e-5)

    # Non-multiple-of-8 batch: exercises padding + the >=2-step (dual-TC) grid.
    B2 = 37
    state2 = jax.random.normal(k_state2, (B2, in_dim), dtype=jnp.float32)
    mean2, std2 = reparam_act_box_forward(state2, w_fused, b_fused, action_dim=A)
    jax.block_until_ready((mean2, std2))
    ref_mean2, ref_std2 = _reference(state2, w_mean, b_mean, w_log_std, b_log_std)
    assert mean2.shape == (B2, action_dim) and std2.shape == (B2, action_dim)
    assert jnp.allclose(mean2, ref_mean2, atol=1e-5, rtol=1e-5)
    assert jnp.allclose(std2, ref_std2, atol=1e-5, rtol=1e-5)

    print("KERNEL_OK")
</pallas_src>

<mosaic_0001>
module attributes {stable_mosaic.version = 11 : i64} {
  func.func @_reparam_box_kernel(%arg0: i32, %arg1: memref<8x32xf32, #tpu.memory_space<vmem>>, %arg2: memref<32x128xf32, #tpu.memory_space<vmem>>, %arg3: memref<1x128xf32, #tpu.memory_space<vmem>>, %arg4: memref<8x128xf32, #tpu.memory_space<vmem>>) attributes {dimension_semantics = [#tpu.dimension_semantics<parallel>], iteration_bounds = array<i64: 1>, scalar_prefetch = 0 : i64, scratch_operands = 0 : i64, tpu.core_type = #tpu.core_type<tc>, window_params = [{transform_indices = @transform_0, window_bounds = array<i64: 8, 32>}, {pipeline_mode = #tpu.pipeline_mode<synchronous>, transform_indices = @transform_1, window_bounds = array<i64: 32, 128>}, {pipeline_mode = #tpu.pipeline_mode<synchronous>, transform_indices = @transform_2, window_bounds = array<i64: 1, 128>}, {transform_indices = @transform_3, window_bounds = array<i64: 8, 128>}]} {
    %c0 = arith.constant 0 : index
    %c0_0 = arith.constant 0 : index
    %0 = vector.load %arg1[%c0, %c0_0] : memref<8x32xf32, #tpu.memory_space<vmem>>, vector<8x32xf32>
    %c0_1 = arith.constant 0 : index
    %c0_2 = arith.constant 0 : index
    %1 = vector.load %arg2[%c0_1, %c0_2] : memref<32x128xf32, #tpu.memory_space<vmem>>, vector<32x128xf32>
    %cst = arith.constant dense<0.000000e+00> : vector<8x128xf32>
    %2 = tpu.matmul %0, %1, %cst {dimension_numbers = #tpu.dot_dimension_numbers<[1], [0], [0], [1], [0, 0, 1, 1], [], []>} : vector<8x32xf32>, vector<32x128xf32>, vector<8x128xf32> -> vector<8x128xf32>
    %c0_3 = arith.constant 0 : index
    %c0_4 = arith.constant 0 : index
    %3 = vector.load %arg3[%c0_3, %c0_4] : memref<1x128xf32, #tpu.memory_space<vmem>>, vector<1x128xf32>
    %4 = vector.broadcast %3 : vector<1x128xf32> to vector<8x128xf32>
    %5 = arith.addf %2, %4 : vector<8x128xf32>
    %cst_5 = arith.constant -1.000000e+01 : f32
    %cst_6 = arith.constant 1.000000e+01 : f32
    %6 = vector.broadcast %cst_5 : f32 to vector<8x128xf32>
    %7 = arith.maximumf %6, %5 : vector<8x128xf32>
    %8 = vector.broadcast %cst_6 : f32 to vector<8x128xf32>
    %9 = arith.minimumf %8, %7 : vector<8x128xf32>
    %10 = math.tanh %9 : vector<8x128xf32>
    %cst_7 = arith.constant 1.000000e+00 : f32
    %11 = vector.broadcast %cst_7 : f32 to vector<8x128xf32>
    %12 = arith.addf %10, %11 : vector<8x128xf32>
    %cst_8 = arith.constant 3.500000e+00 : f32
    %13 = vector.broadcast %cst_8 : f32 to vector<8x128xf32>
    %14 = arith.mulf %13, %12 : vector<8x128xf32>
    %cst_9 = arith.constant -5.000000e+00 : f32
    %15 = vector.broadcast %cst_9 : f32 to vector<8x128xf32>
    %16 = arith.addf %15, %14 : vector<8x128xf32>
    %17 = math.exp %16 : vector<8x128xf32>
    %18 = tpu.iota {dimensions = array<i32: 1>} : vector<8x128xi32>
    %c4_i32 = arith.constant 4 : i32
    %19 = vector.broadcast %c4_i32 : i32 to vector<8x128xi32>
    %20 = arith.cmpi slt, %18, %19 : vector<8x128xi32>
    %21 = arith.select %20, %5, %17 : vector<8x128xi1>, vector<8x128xf32>
    %c0_10 = arith.constant 0 : index
    %c0_11 = arith.constant 0 : index
    %22 = vector.load %arg4[%c0_10, %c0_11] : memref<8x128xf32, #tpu.memory_space<vmem>>, vector<8x128xf32>
    tpu.vector_store %arg4[%c0_10, %c0_11], %21 {strides = array<i32>} : memref<8x128xf32, #tpu.memory_space<vmem>>, vector<8x128xf32>,
    return
  }
  func.func @transform_0(%arg0: i32) -> (i32, i32) {
    %c0_i32 = arith.constant 0 : i32
    %c0_i32_0 = arith.constant 0 : i32
    return %arg0, %c0_i32 : i32, i32
  }
  func.func @transform_1(%arg0: i32) -> (i32, i32) {
    %c0_i32 = arith.constant 0 : i32
    %c0_i32_0 = arith.constant 0 : i32
    %c0_i32_1 = arith.constant 0 : i32
    return %c0_i32, %c0_i32_0 : i32, i32
  }
  func.func @transform_2(%arg0: i32) -> (i32, i32) {
    %c0_i32 = arith.constant 0 : i32
    %c0_i32_0 = arith.constant 0 : i32
    %c0_i32_1 = arith.constant 0 : i32
    return %c0_i32, %c0_i32_0 : i32, i32
  }
  func.func @transform_3(%arg0: i32) -> (i32, i32) {
    %c0_i32 = arith.constant 0 : i32
    %c0_i32_0 = arith.constant 0 : i32
    return %arg0, %c0_i32 : i32, i32
  }
}

</mosaic_0001>

<bundles_post_ra>
// kernel: reparam_act_box_forward.1
= control target key start
LH: loop header
LB: loop body
LE: loop exit
PB: predicated region body
PF: predicated region fallthrough
CT: control target
= control target key end

     0   :  { %8 = vsyncpa [#allocation3], 0  ;;  %s256_s0 = inlined_call_operand.hbm [shape: f32[8,32], index: 0, kind: input, shape index: {}]   ;;  %s257_s1 = inlined_call_operand.hbm [shape: f32[32,128], index: 1, kind: input, shape index: {}]   ;;  %s258_s2 = inlined_call_operand.vmem [shape: f32[1,128], index: 2, kind: input, shape index: {}]   ;;  %s259_s3 = inlined_call_operand.vmem [shape: f32[8,128], index: 3, kind: output, shape index: {}]  }
   0x1   :  { %9 = vsyncpa [#allocation5], 0  ;;  %s218_s12 = smov [#allocation2]   ;;  %s219_s14 = smov [#allocation4]  }
   0x2   :  { %s16_s13 = sshll.u32 %s218_s12, 4  ;;  %s25_s15 = sshll.u32 %s219_s14, 4  ;;  %s17_s13 = int_to_ptr.vmem [resolvable:$true] %s16_s13  ;;  %s26_s15 = int_to_ptr.vmem [resolvable:$true] %s25_s15 }
   0x3   :  { %s182_s16 = scalar_lea.vmem %s17_s13, 128  ;;  %p187_p1 = scmp.lt.s32.totalorder %s17_s13, %s17_s13 }
   0x4   :  { %p183_p0 = scmp.ne.s32.totalorder %s17_s13, %s182_s16  ;;  %p188_p2 = scmp.lt.s32.totalorder %s182_s16, %s182_s16 }
   0x6   :  { %p189_p3 = por %p188_p2, %p187_p1 }
   0x8   :  { %p190_p4 = pnand %p189_p3, %p183_p0 }
   0xa   :  { %193 = shalt.err (!%p190_p4)
}
   0xb   :  { %19 = dma.hbm_to_vmem [thread:$0]  %s256_s0, 128, %s17_s13, [#allocation3]  }
   0xc   :  { %s202_s19 = scalar_lea.vmem %s26_s15, 512  ;;  %p207_p6 = scmp.lt.s32.totalorder %s26_s15, %s26_s15 }
   0xd   :  { %p203_p5 = scmp.ne.s32.totalorder %s26_s15, %s202_s19  ;;  %p208_p7 = scmp.lt.s32.totalorder %s202_s19, %s202_s19 }
   0xf   :  { %p209_p8 = por %p208_p7, %p207_p6 }
  0x11   :  { %p210_p9 = pnand %p209_p8, %p203_p5 }
  0x13   :  { %213 = shalt.err (!%p210_p9)
}
  0x14   :  { %s220_s20 = smov 128   ;;  %s221_s21 = smov 8  }
  0x15   :  { %31 = dma.hbm_to_vmem [thread:$0]  %s257_s1, 512, %s26_s15, [#allocation5], %s220_s20, %s220_s20, %s221_s21  }
  0x16   :  { %214 = dma.done.wait [#allocation3], 128  }
  0x17   :  { %215 = vsyncadd [#allocation3], 4294967168 }
  0x18   :  { %216 = dma.done.wait [#allocation5], 512  }
  0x19   :  { %217 = vsyncadd [#allocation5], 4294966784  ;;  %v222_v0 = vmov 0.0   ;;  %vm223_vm0 = vmmov 0   ;;  %v44_v1 = vld [vmem:[#allocation4 + $0x18] sm:$0xff]  ;;  %v43_v2 = vld [vmem:[#allocation4 + $0x10] sm:$0xff]  ;;  %v134_v16 = vlaneseq }
  0x1a   :  { %153 = vmatprep.subr.mxu0 %v222_v0  ;;  %161 = vmatprep.mubr.msk.f32.mxu0 %vm223_vm0, %v222_v0  ;;  %v42_v3 = vld [vmem:[#allocation4 + $0x8] sm:$0xff]  ;;  %v41_v4 = vld [vmem:[#allocation4] sm:$0xff]  ;;  %v40_v5 = vld [vmem:[#allocation2] sm:$0xff]  ;;  %vm52_vm1 = vcmask 261120  }
  0x1b   :  { %154 = vmatpush3.msra.mxu0 %v44_v1  ;;  %v145_v6 = vld [vmem:[%s258_s2] ss:$0 sm:$0xff]  ;;  %v135_v17 = vand.u32 127, %v134_v16 }
  0x1c   :  { %155 = vmatprep.subr.mxu0 %v222_v0 }
  0x1d   :  { %156 = vmatpush3.msra.mxu0 %v43_v2  ;;  %vm136_vm2 = vcmp.lt.s32.totalorder %v135_v17, 4 }
  0x1e   :  { %157 = vmatprep.subr.mxu0 %v222_v0 }
  0x1f   :  { %158 = vmatpush3.msra.mxu0 %v42_v3 }
  0x20   :  { %159 = vmatprep.subr.mxu0 %v222_v0 }
  0x21   :  { %160 = vmatpush3.msra.mxu0 %v41_v4 }
  0x22   :  { %162 = vmatmul.mubr.msk.f32.vlgmr.msra.gmra.mxu0 %vm52_vm1, %v40_v5 }
  0xe2   :  { %v122_v7 = vpop.f32.mrf.mxu0 }
  0xe3   :  { %v123_v8 = vadd.f32 %v145_v6, %v122_v7 }
  0xe4   :  { %v163_v9 = vpop.f32.mrf.mxu0 }
  0xe5   :  { %v147_v10 = vclamps-f32 %v123_v8, 10.0 }
  0xe7   :  { %170 = vtanh.f32 %v147_v10 }
  0xf4   :  { %v171_v11 = vpop.eup %170 }
  0xf5   :  { %v129_v12 = vadd.f32 1.0, %v171_v11 }
  0xf7   :  { %v130_v13 = vmul.f32 3.5, %v129_v12 }
  0xf9   :  { %v131_v14 = vadd.f32 -5.0, %v130_v13 }
  0xfb   :  { %v132_v15 = vmul.f32 1.442695, %v131_v14 }
  0xfd   :  { %172 = vpow2.f32 %v132_v15 }
 0x10a   :  { %v173_v18 = vpop.eup %172 }
 0x10b   :  { %v137_v19 = vsel %vm136_vm2, %v123_v8, %v173_v18 }
 0x10c   :  { %138 = vst [vmem:[%s259_s3] sm:$0xff] %v137_v19 }
 0x10d   :  { %143 = vsyncpa [#allocation3], 1 }
 0x10e   :  { %144 = vsyncpa [#allocation5], 1 }

</bundles_post_ra>
